<compile_context>
chip_gen: v7x
topology: tpu7x:2x2x1
jax: 0.10.0
libtpu: 0.0.40
codegen_flags: <defaults>
</compile_context>

<pallas_src>
import jax
import jax.numpy as jnp
from jax.experimental import pallas as pl
from jax.experimental.pallas import tpu as pltpu


# ----------------------------------------------------------------------------
# Static (once-per-model) parameter preprocessing — NOT in the per-call path.
# ----------------------------------------------------------------------------
def fuse_weight(connections, nearest_neighbors, weight, dtype=jnp.float32):
    """Fuse both static masks with the weight ONCE, stored transposed (out, in).

      W_eff   = (connections * nearest_neighbors) * weight.T        # (in, out)
      returns   W_eff.T = (connections * nearest_neighbors).T * weight  # (out, in)

    Pass dtype=jnp.bfloat16 to pre-cast the fused weight in HBM (halves the
    weight-stream DMA bytes when feeding the MXU in bf16; accumulation stays f32).
    """
    in_f, out_f = connections.shape
    assert nearest_neighbors.shape == (in_f, in_f)
    assert in_f == out_f, (
        "NearestNeighborSparseLayer forward is only well-defined for "
        "in_features == out_features")
    assert weight.shape == (out_f, in_f)
    return ((connections * nearest_neighbors).T * weight).astype(dtype)


def extract_tridiagonal(connections, nearest_neighbors, weight):
    """While nearest_neighbors keeps its init-time tridiagonal structure, W_eff
    has only three nonzero diagonals.  Extract them once as (N,) vectors.
       W_eff[i, j] = (connections * nearest_neighbors)[i, j] * weight[j, i]
    The boundary zeros (d_sub[0], d_sup[N-1]) are what kill the circular
    wrap-around of pltpu.roll in the kernel — do not drop them.
    """
    m = connections * nearest_neighbors                   # (N, N)
    zero = jnp.zeros((1,), m.dtype)
    d_main = jnp.diagonal(m) * jnp.diagonal(weight)                        # W_eff[j, j]
    d_sub = jnp.concatenate(                                               # W_eff[j-1, j]
        [zero, jnp.diagonal(m, offset=1) * jnp.diagonal(weight, offset=-1)])
    d_sup = jnp.concatenate(                                               # W_eff[j+1, j]
        [jnp.diagonal(m, offset=-1) * jnp.diagonal(weight, offset=1), zero])
    return d_sub, d_main, d_sup


# ----------------------------------------------------------------------------
# Tiling helpers.
# ----------------------------------------------------------------------------
def _pad_to(arr, axis, mult):
    size = arr.shape[axis]
    pad = (-size) % mult
    if pad == 0:
        return arr
    cfg = [(0, 0)] * arr.ndim
    cfg[axis] = (0, pad)
    return jnp.pad(arr, cfg)


def _vmem_caps():
    """(tile-plan byte budget, vmem_limit_bytes) — generation-aware."""
    try:
        cap = int(pltpu.get_tpu_info().vmem_capacity_bytes)
    except Exception:
        cap = 64 * 1024 * 1024          # conservative: v7x per-TensorCore VMEM
    vmem_limit = min(int(cap * 0.75), 96 * 1024 * 1024)   # 48 MiB on v7x, 96 MiB on v5e/v6e
    budget = int(vmem_limit * 0.8)      # headroom for out buffers / compiler scratch
    return budget, vmem_limit


def _pick(dim, candidates):
    for c in candidates:
        if c <= dim and dim % c == 0:
            return c
    return dim


def _choose_tiles(B, N, K, budget):
    """B, N, K are already padded to (8, 128)-friendly multiples."""
    # tm: whole batch when reasonable -> the weight streams over HBM exactly once.
    tm = B if B <= 512 else _pick(B, (512, 256, 128, 64, 32, 16, 8))
    # tn: multiples of 256 preferred (256-wide MXU on v6e/v7x), 128 minimum.
    tn = _pick(N, (512, 256, 128))

    def fits(tk_, tn_=None, tm_=None):
        tn_ = tn if tn_ is None else tn_
        tm_ = tm if tm_ is None else tm_
        # double-buffered x & w tiles + out tile + f32 accumulator (all f32-sized)
        return 4 * (2 * tm_ * tk_ + 2 * tn_ * tk_ + 2 * tm_ * tn_) <= budget

    # Prefer tk = K: drops the reduction grid axis, accumulator RMW and
    # init/finalize phases entirely.
    if fits(K):
        tk = K
    else:
        tk = _pick(K, (1024, 512, 256, 128))
        while not fits(tk) and tk > 128 and (tk // 2) % 128 == 0:
            tk //= 2
        while not fits(tk) and tn > 128:
            tn //= 2
        while not fits(tk) and tm > 8 and (tm // 2) % 8 == 0:
            tm //= 2

    # Guarantee >= 2 blocks on a parallel axis so both v7x TensorCores engage.
    if (B // tm) * (N // tn) < 2:
        if N // tn < 2 and tn > 128:
            tn //= 2
        elif B // tm < 2 and tm > 8 and (tm // 2) % 8 == 0:
            tm //= 2
    return tm, tn, tk


# ----------------------------------------------------------------------------
# General dense path: single fused-weight operand.
# ----------------------------------------------------------------------------
def _make_dense_kernel_single_shot(has_bias):
    """tk == K: no reduction axis, no accumulator scratch."""
    def kernel(x_ref, w_ref, *rest):
        if has_bias:
            b_ref, o_ref = rest
        else:
            (o_ref,) = rest
        x = x_ref[...]
        w = w_ref[...]
        if w.dtype != jnp.float32:          # pre-cast (bf16) fused weight in HBM
            x = x.astype(w.dtype)
        out = jax.lax.dot_general(
            x, w, dimension_numbers=(((1,), (1,)), ((), ())),
            preferred_element_type=jnp.float32)
        if has_bias:
            out = out + b_ref[...]
        o_ref[...] = out.astype(o_ref.dtype)
    return kernel


def _make_dense_kernel_ktiled(has_bias):
    """Reduction axis last, f32 VMEM accumulator, bias added at the final step."""
    def kernel(x_ref, w_ref, *rest):
        if has_bias:
            b_ref, o_ref, acc_ref = rest
        else:
            o_ref, acc_ref = rest
        k = pl.program_id(2)

        @pl.when(k == 0)
        def _init():
            acc_ref[...] = jnp.zeros_like(acc_ref)

        x = x_ref[...]
        w = w_ref[...]
        if w.dtype != jnp.float32:
            x = x.astype(w.dtype)
        acc_ref[...] += jax.lax.dot_general(
            x, w, dimension_numbers=(((1,), (1,)), ((), ())),
            preferred_element_type=jnp.float32)

        @pl.when(k == pl.num_programs(2) - 1)
        def _finalize():
            out = acc_ref[...]
            if has_bias:
                out = out + b_ref[...]
            o_ref[...] = out.astype(o_ref.dtype)
    return kernel


def nearest_neighbor_sparse_forward(x, w_fused, bias=None):
    """General path.
    x: (B, in); w_fused: (out, in) from fuse_weight(); bias: (out,) or None.
    Returns (B, out)."""
    B, in_f = x.shape
    out_f, in_f2 = w_fused.shape
    assert in_f == in_f2, "w_fused must be (out_features, in_features) from fuse_weight()"
    has_bias = bias is not None
    if has_bias:
        assert bias.shape == (out_f,)

    # Zero-pad to (8, 128)-friendly multiples; padding contributes zeros only.
    xp = _pad_to(_pad_to(x, 0, 8), 1, 128)
    wp = _pad_to(_pad_to(w_fused, 0, 128), 1, 128)
    Bp, Kp = xp.shape
    Np = wp.shape[0]

    budget, vmem_limit = _vmem_caps()
    tm, tn, tk = _choose_tiles(Bp, Np, Kp, budget)
    k_tiled = tk < Kp

    cost = pl.CostEstimate(
        flops=2 * Bp * Np * Kp,
        transcendentals=0,
        bytes_accessed=4 * (Bp * Kp + Bp * Np + (Np if has_bias else 0))
        + int(wp.dtype.itemsize) * Np * Kp)

    args = [xp, wp]
    if k_tiled:
        grid = (Bp // tm, Np // tn, Kp // tk)
        in_specs = [pl.BlockSpec((tm, tk), lambda i, j, k: (i, k)),   # x
                    pl.BlockSpec((tn, tk), lambda i, j, k: (j, k))]   # fused weight
        if has_bias:
            in_specs.append(pl.BlockSpec((1, tn), lambda i, j, k: (0, j)))
            args.append(_pad_to(bias.reshape(1, out_f).astype(jnp.float32), 1, 128))
        out_spec = pl.BlockSpec((tm, tn), lambda i, j, k: (i, j))
        scratch = [pltpu.VMEM((tm, tn), jnp.float32)]
        semantics = ("parallel", "parallel", "arbitrary")
        kernel = _make_dense_kernel_ktiled(has_bias)
    else:
        grid = (Bp // tm, Np // tn)
        in_specs = [pl.BlockSpec((tm, Kp), lambda i, j: (i, 0)),      # x
                    pl.BlockSpec((tn, Kp), lambda i, j: (j, 0))]      # fused weight
        if has_bias:
            in_specs.append(pl.BlockSpec((1, tn), lambda i, j: (0, j)))
            args.append(_pad_to(bias.reshape(1, out_f).astype(jnp.float32), 1, 128))
        out_spec = pl.BlockSpec((tm, tn), lambda i, j: (i, j))
        scratch = []
        semantics = ("parallel", "parallel")
        kernel = _make_dense_kernel_single_shot(has_bias)

    yp = pl.pallas_call(
        kernel,
        out_shape=jax.ShapeDtypeStruct((Bp, Np), x.dtype),
        grid=grid,
        in_specs=in_specs,
        out_specs=out_spec,
        scratch_shapes=scratch,
        compiler_params=pltpu.CompilerParams(
            dimension_semantics=semantics,
            vmem_limit_bytes=vmem_limit),
        cost_estimate=cost,
    )(*args)
    return yp[:B, :out_f]


# ----------------------------------------------------------------------------
# Fast path: exploit the tridiagonal nearest_neighbors structure.
#   y[:, j] = x[:, j-1]*d_sub[j] + x[:, j]*d_main[j] + x[:, j+1]*d_sup[j] (+ bias)
# O(3*B*N) VPU/XLU work and only 3*N weight values DMA'd (vs N^2 for the dense path).
# ----------------------------------------------------------------------------
def _make_tridiag_kernel(has_bias, feat):
    def kernel(x_ref, d_ref, o_ref):
        x = x_ref[...]                                    # (tm, N)
        d = d_ref[...]                                    # (4, N): sub, main, sup, bias
        # Circular lane rotations on the XLU (separate VLIW slot from the VPU
        # muls).  Wrap-around terms are killed by the zero boundary entries of
        # d_sub[0] / d_sup[N-1].  NOTE: pltpu.roll needs a non-negative axis.
        x_prev = pltpu.roll(x, shift=1, axis=1)           # x[:, j-1]
        x_next = pltpu.roll(x, shift=feat - 1, axis=1)    # x[:, j+1]
        y = x_prev * d[0:1, :] + x * d[1:2, :] + x_next * d[2:3, :]
        if has_bias:
            y = y + d[3:4, :]
        o_ref[...] = y.astype(o_ref.dtype)
    return kernel


def nearest_neighbor_sparse_forward_tridiag(x, d_sub, d_main, d_sup, bias=None,
                                            *, tm=None):
    """Specialized path (valid while the fused mask keeps its tridiagonal band
    structure, e.g. at module init).  x: (B, N); diagonals from
    extract_tridiagonal(); bias: (N,) or None."""
    B, feat = x.shape
    assert d_sub.shape == d_main.shape == d_sup.shape == (feat,)
    has_bias = bias is not None
    if has_bias:
        assert bias.shape == (feat,)

    xp = _pad_to(x, 0, 8)
    Bp = xp.shape[0]

    if tm is None:
        budget, _ = _vmem_caps()
        tm = Bp
        # Mem-bound path: keep blocks big, but still split into >= 2 grid
        # blocks when possible so both v7x TensorCores engage.
        if Bp >= 16 and (Bp // 2) % 8 == 0:
            tm = Bp // 2
        while 4 * 2 * tm * feat > budget and tm > 8 and (tm // 2) % 8 == 0:
            tm //= 2

    # Pack the three diagonals (+ bias, zero if unused) into ONE (4, N)
    # operand: a single small DMA per block instead of four descriptors.
    zero = jnp.zeros((feat,), x.dtype)
    d_pack = jnp.stack(
        [d_sub.astype(x.dtype), d_main.astype(x.dtype), d_sup.astype(x.dtype),
         bias.astype(x.dtype) if has_bias else zero], axis=0)   # (4, N)

    yp = pl.pallas_call(
        _make_tridiag_kernel(has_bias, feat),
        out_shape=jax.ShapeDtypeStruct((Bp, feat), x.dtype),
        grid=(Bp // tm,),
        in_specs=[pl.BlockSpec((tm, feat), lambda i: (i, 0)),
                  pl.BlockSpec((4, feat), lambda i: (0, 0))],
        out_specs=pl.BlockSpec((tm, feat), lambda i: (i, 0)),
        compiler_params=pltpu.CompilerParams(
            dimension_semantics=("parallel",)),
    )(xp, d_pack)
    return yp[:B]


# ----------------------------------------------------------------------------
# Deterministic re-implementation of the PyTorch __init__.
# ----------------------------------------------------------------------------
def init_params(key, in_features, out_features, sparsity=0.5):
    k_perm, k_w = jax.random.split(key)

    # connections: random binary mask with int(in*out*sparsity) active entries.
    max_connections = int(in_features * out_features * sparsity)
    perm = jax.random.permutation(k_perm, in_features * out_features)
    flat = jnp.zeros((in_features * out_features,), jnp.float32)
    flat = flat.at[perm[:max_connections]].set(1.0)
    connections = flat.reshape(in_features, out_features)

    # nearest_neighbors: tri-diagonal ones (i-1, i, i+1).
    idx_i = jnp.arange(in_features)[:, None]
    idx_j = jnp.arange(in_features)[None, :]
    nearest_neighbors = (jnp.abs(idx_i - idx_j) <= 1).astype(jnp.float32)

    # weight: xavier_uniform_ over shape (out, in).
    bound = (6.0 / (in_features + out_features)) ** 0.5
    weight = jax.random.uniform(
        k_w, (out_features, in_features), jnp.float32, -bound, bound)

    bias = jnp.zeros((out_features,), jnp.float32)
    return connections, nearest_neighbors, weight, bias


if __name__ == "__main__":
    key = jax.random.PRNGKey(0)
    k_param, k_x = jax.random.split(key)

    # Small but lane-dense shapes (out_features a multiple of 128) so output
    # stores are full-width vst.
    in_features = out_features = 256
    batch = 16

    connections, nearest_neighbors, weight, bias = init_params(
        k_param, in_features, out_features, sparsity=0.5)
    x = jax.random.normal(k_x, (batch, in_features), jnp.float32)

    # Once-per-model preprocessing (outside the per-forward-call path).
    w_fused = fuse_weight(connections, nearest_neighbors, weight)      # (out, in)
    d_sub, d_main, d_sup = extract_tridiagonal(
        connections, nearest_neighbors, weight)

    # Pure-JAX reference of the module forward.
    w_eff = (connections * nearest_neighbors) * weight.T
    y_ref = x @ w_eff + bias

    # Tolerances cover the TPU's default (bf16-pass) f32 matmul precision.
    TOL = dict(atol=5e-3, rtol=5e-3)

    # 1) General dense path (single fused-weight operand, with bias).
    y_dense = jax.block_until_ready(
        nearest_neighbor_sparse_forward(x, w_fused, bias))
    assert y_dense.shape == (batch, out_features)
    assert jnp.allclose(y_dense, y_ref, **TOL), (
        float(jnp.max(jnp.abs(y_dense - y_ref))))

    # 1b) bias=None variant — no bias operand, no VPU add.
    y_nobias = jax.block_until_ready(
        nearest_neighbor_sparse_forward(x, w_fused, None))
    assert jnp.allclose(y_nobias, x @ w_eff, **TOL)

    # 2) Tridiagonal fast path (exact while the fused mask stays tridiagonal).
    y_tri = jax.block_until_ready(
        nearest_neighbor_sparse_forward_tridiag(x, d_sub, d_main, d_sup, bias))
    assert y_tri.shape == (batch, out_features)
    assert jnp.allclose(y_tri, y_ref, **TOL)

    # TODO(synk): gradients / training path (learnable connections &
    # nearest_neighbors masks) not ported; the tridiagonal fast path assumes
    # the mask keeps its init-time band structure.
    print("KERNEL_OK")
</pallas_src>

<mosaic_0001>
module attributes {stable_mosaic.version = 11 : i64} {
  func.func @kernel(%arg0: i32, %arg1: i32, %arg2: memref<16x256xf32, #tpu.memory_space<vmem>>, %arg3: memref<128x256xf32, #tpu.memory_space<vmem>>, %arg4: memref<1x128xf32, #tpu.memory_space<vmem>>, %arg5: memref<16x128xf32, #tpu.memory_space<vmem>>) attributes {dimension_semantics = [#tpu.dimension_semantics<parallel>, #tpu.dimension_semantics<parallel>], iteration_bounds = array<i64: 1, 2>, scalar_prefetch = 0 : i64, scratch_operands = 0 : i64, tpu.core_type = #tpu.core_type<tc>, window_params = [{transform_indices = @transform_0, window_bounds = array<i64: 16, 256>}, {transform_indices = @transform_1, window_bounds = array<i64: 128, 256>}, {transform_indices = @transform_2, window_bounds = array<i64: 1, 128>}, {transform_indices = @transform_3, window_bounds = array<i64: 16, 128>}]} {
    %c0 = arith.constant 0 : index
    %c0_0 = arith.constant 0 : index
    %0 = vector.load %arg2[%c0, %c0_0] : memref<16x256xf32, #tpu.memory_space<vmem>>, vector<16x256xf32>
    %c0_1 = arith.constant 0 : index
    %c0_2 = arith.constant 0 : index
    %1 = vector.load %arg3[%c0_1, %c0_2] : memref<128x256xf32, #tpu.memory_space<vmem>>, vector<128x256xf32>
    %cst = arith.constant dense<0.000000e+00> : vector<16x128xf32>
    %2 = tpu.matmul %0, %1, %cst {dimension_numbers = #tpu.dot_dimension_numbers<[1], [1], [0], [0], [0, 0, 1, 0], [], []>} : vector<16x256xf32>, vector<128x256xf32>, vector<16x128xf32> -> vector<16x128xf32>
    %c0_3 = arith.constant 0 : index
    %c0_4 = arith.constant 0 : index
    %3 = vector.load %arg4[%c0_3, %c0_4] : memref<1x128xf32, #tpu.memory_space<vmem>>, vector<1x128xf32>
    %4 = vector.broadcast %3 : vector<1x128xf32> to vector<16x128xf32>
    %5 = arith.addf %2, %4 : vector<16x128xf32>
    %c0_5 = arith.constant 0 : index
    %c0_6 = arith.constant 0 : index
    %6 = vector.load %arg5[%c0_5, %c0_6] : memref<16x128xf32, #tpu.memory_space<vmem>>, vector<16x128xf32>
    tpu.vector_store %arg5[%c0_5, %c0_6], %5 {strides = array<i32>} : memref<16x128xf32, #tpu.memory_space<vmem>>, vector<16x128xf32>,
    return
  }
  func.func @transform_0(%arg0: i32, %arg1: i32) -> (i32, i32) {
    %c0_i32 = arith.constant 0 : i32
    %c0_i32_0 = arith.constant 0 : i32
    return %arg0, %c0_i32 : i32, i32
  }
  func.func @transform_1(%arg0: i32, %arg1: i32) -> (i32, i32) {
    %c0_i32 = arith.constant 0 : i32
    %c0_i32_0 = arith.constant 0 : i32
    return %arg1, %c0_i32 : i32, i32
  }
  func.func @transform_2(%arg0: i32, %arg1: i32) -> (i32, i32) {
    %c0_i32 = arith.constant 0 : i32
    %c0_i32_0 = arith.constant 0 : i32
    return %c0_i32, %arg1 : i32, i32
  }
  func.func @transform_3(%arg0: i32, %arg1: i32) -> (i32, i32) {
    %c0_i32 = arith.constant 0 : i32
    return %arg0, %arg1 : i32, i32
  }
}

</mosaic_0001>

<bundles_post_ra>
// kernel: tpu_custom_call.1
= control target key start
LH: loop header
LB: loop body
LE: loop exit
PB: predicated region body
PF: predicated region fallthrough
CT: control target
= control target key end

     0   :  { %8 = vsyncpa [#allocation3], 0  ;;  %s1072_s0 = inlined_call_operand.hbm [shape: f32[16,256], index: 0, kind: input, shape index: {}]   ;;  %s1073_s1 = inlined_call_operand.hbm [shape: f32[256,256], index: 1, kind: input, shape index: {}]   ;;  %s1074_s2 = inlined_call_operand.vmem [shape: f32[1,256], index: 2, kind: input, shape index: {}]   ;;  %s1075_s3 = inlined_call_operand.hbm [shape: f32[16,256], index: 3, kind: output, shape index: {}]  }
   0x1   :  { %9 = vsyncpa [#allocation6], 0 }
   0x2   :  { %11 = vsyncpa [#allocation6 + $0x1], 0 }
   0x3   :  { %12 = vsyncpa [#allocation4], 0 }
   0x4   :  { %14 = vsyncpa [#allocation4 + $0x1], 0  ;;  %s807_s12 = smov 0   ;;  %s809_s13 = smov 0  }
   0x5   :  { %s811_s14 = smov 0   ;;  %s813_s15 = smov 0  }
   0x6   :  { %s815_s16 = smov 0   ;;  %s817_s17 = smov 0  }
   0x7 LB: > { %s487_s18 = sadd.s32 4294967295, %s777_s17   ;;  %s488_s19 = sadd.s32 4294967294, %s777_s17   ;;  %s777_s17 = sphi %s817_s17, %s20_s17   ;;  %s773_s16 = sphi %s815_s16, %s1099_s16   ;;  %s769_s15 = sphi %s813_s15, %s1098_s15   ;;  %s765_s14 = sphi %s811_s14, %s1097_s14   ;;  %s761_s13 = sphi %s809_s13, %s1096_s13   ;;  %s757_s12 = sphi %s807_s12, %s1095_s12  }
   0x8   : > { %p78_p0 = scmp.ne.s32.totalorder %s761_s13, %s757_s12  ;;  %p841_p1 = scmp.eq.s32.totalorder %s487_s18, 0 }
   0x9   : > { %p845_p2 = scmp.eq.s32.totalorder %s487_s18, 1  ;;  %p136_p3 = scmp.eq.s32.totalorder %s488_s19, 1 }
   0xa   : > { %s1080_s20 = scalar_select %p841_p1, 1, 0 }
   0xb   : > { %s1081_s21 = scalar_select %p845_p2, 1, 0 }
   0xc   : > { %p851_p4 = por %p841_p1, %p78_p0  ;;  %p489_p5 = scmp.ge.s32.totalorder %s777_s17, 1 }
   0xd   : > { %p856_p6 = por %p136_p3, %p78_p0  ;;  %p143_p7 = scmp.lt.s32.totalorder %s777_s17, 3 }
   0xe   : > { %s1082_s22 = scalar_select %p851_p4, 1, 0 }
   0xf   : > { %s1083_s23 = scalar_select %p856_p6, 1, 0 }
  0x10   : > { %p861_p8 = pnand %p489_p5, %p143_p7  ;;  %s779_s25 = smov [#allocation2]  }
  0x11   : > { %s159_s26 = sshll.u32 %s779_s25, 4  ;;  %s29_s28 = sadd.s32 1, %s773_s16  ;;  %s160_s26 = int_to_ptr.vmem [resolvable:$true] %s159_s26 }
  0x12   : > { %s1084_s24 = scalar_select %p861_p8, 1, 0 }
  0x13   : > { %p563_p9 = pneg %p861_p8  ;;  %s633_s4 = scalar_lea.hbm %s1072_s0, 512 }
  0x14   : > { %p634_p12 = scmp.ne.s32.totalorder %s1072_s0, %s633_s4  ;;  %p640_p5 = scmp.lt.u32.totalorder %s633_s4, %s1072_s0 }
  0x15   : > { %p870_p11 = pnand %p563_p9, %p841_p1 }
  0x17   : > { %p635_p13 = pneg %p870_p11 }
  0x19   : > { %p636_p0 = pnand %p635_p13, %p634_p12 }
  0x1b   : > { %p637_p3 = pneg %p636_p0 }
  0x1d   : > { %p642_p7 = pnand %p640_p5, %p637_p3 }
  0x1f   : > { %645 = shalt.err (!%p642_p7)
}
  0x20   : > { %s646_s9 = scalar_lea.vmem %s160_s26, 512  ;;  %p654_p4 = scmp.lt.s32.totalorder %s160_s26, %s160_s26 }
  0x21   : > { %p647_p9 = scmp.ne.s32.totalorder %s160_s26, %s646_s9  ;;  %p655_p1 = scmp.lt.s32.totalorder %s646_s9, %s646_s9 }
  0x23   : > { %p649_p10 = pnand %p647_p9, %p635_p13  ;;  %p656_p8 = por %p655_p1, %p654_p4 }
  0x25   : > { %p650_p6 = pneg %p649_p10 }
  0x27   : > { %p657_p2 = pnand %p656_p8, %p650_p6 }
  0x29   : > { %660 = shalt.err (!%p657_p2)
}
  0x2a   : > { %s780_s10 = smov 256   ;;  %s781_s11 = smov 16  }
  0x2b   : > { %566 = dma.hbm_to_vmem [thread:$0]  (!%p870_p11), %s1072_s0, 512, %s160_s26, [#allocation3], %s780_s10, %s780_s10, %s781_s11  }
  0x2c   : > { %p30_p1 = scmp.ge.s32.totalorder %s29_s28, 2  ;;  %s65_s25 = sadd.s32 1, %s765_s14 }
  0x2d   : > { %p72_p2 = scmp.ne.s32.totalorder %s765_s14, %s761_s13  ;;  %p73_p4 = scmp.eq.s32.totalorder %s777_s17, 0 }
  0x2e   : > { %s1101_s28 = smov (%p30_p1, %s29_s28), 0  ;;  %p1087_p8 = scmp.ne.s32.totalorder %s1081_s21, 0 }
  0x2f   : > { %p900_p6 = por %p73_p4, %p72_p2  ;;  %s62_s30 = ssub.s32 %s773_s16, %s1101_s28 }
  0x30   : > { %p906_p10 = por %p1087_p8, %p72_p2  ;;  %p576_p12 = scmp.lt.s32.totalorder %s777_s17, 2 }
  0x31   : > { %p63_p11 = scmp.eq.s32.totalorder %s62_s30, 0  ;;  %s173_s26 = sand.u32 1, %s765_s14  }
  0x32   : > { %s492_s4 = sshll.u32 %s173_s26, 8  ;;  %s506_s6 = sshll.u32 %s773_s16, 12 }
  0x33   : > { %s915_s5 = scalar_select %p63_p11, %s765_s14, %s65_s25  }
  0x34   : > { %s921_s9 = scalar_lea.hbm %s1073_s1, %s506_s6  ;;  %s177_s21 = scalar_lea.vmem [#allocation5], %s492_s4 }
  0x35   : > { %s185_s18 = sshll.u32 %s177_s21, 4  ;;  %p927_p13 = pnand %p576_p12, %p900_p6  ;;  %s923_s18 = int_to_ptr.vmem [resolvable:$true] %s185_s18 }
  0x36   : > { %s931_s25 = scalar_lea.sflag [#allocation6], %s173_s26  ;;  %s661_s30 = scalar_lea.hbm %s921_s9, 4096 }
  0x37   : > { %p662_p0 = scmp.ne.s32.totalorder %s921_s9, %s661_s30  ;;  %p663_p3 = pneg %p927_p13 }
  0x38   : > { %s666_s29 = scalar_lea.hbm %s1073_s1, 8192  ;;  %p667_p9 = scmp.lt.u32.totalorder %s921_s9, %s1073_s1 }
  0x39   : > { %p664_p5 = pnand %p663_p3, %p662_p0  ;;  %p668_p1 = scmp.lt.u32.totalorder %s666_s29, %s661_s30 }
  0x3a   : > { %p670_p4 = scmp.lt.u32.totalorder %s661_s30, %s921_s9 }
  0x3b   : > { %p665_p7 = pneg %p664_p5  ;;  %p669_p2 = por %p668_p1, %p667_p9 }
  0x3d   : > { %p671_p6 = por %p670_p4, %p669_p2 }
  0x3f   : > { %p672_p8 = pnand %p671_p6, %p665_p7 }
  0x41   : > { %675 = shalt.err (!%p672_p8)
}
  0x42   : > { %s676_s26 = scalar_lea.vmem %s923_s18, 4096  ;;  %s782_s21 = smov [#allocation5]  }
  0x43   : > { %p677_p12 = scmp.ne.s32.totalorder %s923_s18, %s676_s26  ;;  %s681_s4 = sshll.u32 %s782_s21, 4  ;;  %s682_s4 = int_to_ptr.vmem [resolvable:$false] %s681_s4 }
  0x44   : > { %s683_s6 = scalar_lea.vmem %s682_s4, 8192  ;;  %p684_p5 = scmp.lt.s32.totalorder %s923_s18, %s682_s4 }
  0x45   : > { %p679_p11 = pnand %p677_p12, %p663_p3  ;;  %p685_p9 = scmp.lt.s32.totalorder %s683_s6, %s676_s26 }
  0x47   : > { %p680_p0 = pneg %p679_p11  ;;  %p686_p1 = por %p685_p9, %p684_p5 }
  0x49   : > { %p687_p2 = pnand %p686_p1, %p680_p0 }
  0x4b   : > { %690 = shalt.err (!%p687_p2)
}
  0x4c   : > { %570 = dma.hbm_to_vmem [thread:$0]  (!%p927_p13), %s921_s9, 4096, %s923_s18, %s931_s25, %s780_s10, %s780_s10, %s781_s11  }
  0x4d   : > { %p1090_p3 = scmp.ne.s32.totalorder %s1084_s24, 0 }
  0x4e   : > { %p1091_p7 = scmp.ne.s32.totalorder (!%p1090_p3), %s1080_s20, 0 }
  0x4f   : > { %203 = sbr.rel (%p1090_p3) target bundleno = 388 (0x184), region = 32 }
  0x56   : > { %744 = dma.done.wait (%p1091_p7), [#allocation3], 512  }
  0x57   : > { %746 = vsyncadd (%p1091_p7), [#allocation3], 4294966784  ;;  %s969_s30 = sand.u32 1, %s761_s13   ;;  %p1092_p13 = scmp.ne.s32.totalorder %s1082_s22, 0 }
  0x58   : > { %s498_s19 = sshll.u32 %s969_s30, 8  ;;  %s210_s29 = scalar_lea.sflag [#allocation6], %s969_s30 }
  0x59   : > { %s973_s7 = scalar_lea.vmem [#allocation5], %s498_s19 }
  0x5a   : > { %748 = dma.done.wait (%p1092_p13), %s210_s29, 4096  }
  0x5b   : > { %750 = vsyncadd (%p1092_p13), %s210_s29, 4294963200  ;;  %v250_v0 = vld [vmem:[%s973_s7 + $0x8] sm:$0xff]  ;;  %v252_v1 = vld [vmem:[%s973_s7 + $0x18] sm:$0xff]  ;;  %p241_p4 = scmp.lt.s32.totalorder %s769_s15, 1  ;;  %s499_s20 = sshll.u32 %s969_s30, 4 }
  0x5c   : > { %v249_v2 = vld [vmem:[%s973_s7] sm:$0xff]  ;;  %v507_v3 = vpack.c.bf16 %v252_v1, %v250_v0  ;;  %v251_v4 = vld [vmem:[%s973_s7 + $0x10] sm:$0xff]  ;;  %v254_v5 = vld [vmem:[%s973_s7 + $0x28] sm:$0xff]  ;;  %s238_s9 = scalar_lea.vmem [#allocation7], %s499_s20  ;;  %s502_s25 = sshll.u32 %s769_s15, 7 }
  0x5d   : > { %v256_v6 = vld [vmem:[%s973_s7 + $0x38] sm:$0xff]  ;;  %v509_v7 = vpack.c.bf16 %v251_v4, %v249_v2  ;;  %v253_v9 = vld [vmem:[%s973_s7 + $0x20] sm:$0xff]  ;;  %v255_v10 = vld [vmem:[%s973_s7 + $0x30] sm:$0xff]  ;;  %s242_s22 = scalar_select %p241_p4, %s769_s15, 1 }
  0x5e   : > { %v511_v8 = vpack.c.bf16 %v256_v6, %v254_v5  ;;  %508 = vmatprep.subr.bf16.mxu0 %v507_v3  ;;  %539 = vmatprep.subr.bf16.mxu1 %v507_v3  ;;  %v258_v11 = vld [vmem:[%s973_s7 + $0x48] sm:$0xff]  ;;  %v260_v12 = vld [vmem:[%s973_s7 + $0x58] sm:$0xff]  ;;  %v513_v13 = vpack.c.bf16 %v255_v10, %v253_v9  ;;  %v257_v17 = vld [vmem:[%s973_s7 + $0x40] sm:$0xff]  ;;  %s381_s18 = sshll.u32 %s238_s9, 4  ;;  %s1023_s21 = scalar_lea.hbm %s1075_s3, %s502_s25  ;;  %s1018_s18 = int_to_ptr.vmem [resolvable:$true] %s381_s18 }
  0x5f   : > { %510 = vmatpush1.bf16.xpose.msra.mxu0 %v509_v7  ;;  %547 = vmatpush1.bf16.xpose.msra.mxu1 %v509_v7  ;;  %v515_v14 = vpack.c.bf16 %v260_v12, %v258_v11  ;;  %v246_v15 = vld [vmem:[#allocation2 + $0x8] sm:$0xff]  ;;  %v248_v16 = vld [vmem:[#allocation2 + $0x18] sm:$0xff]  ;;  %v259_v18 = vld [vmem:[%s973_s7 + $0x50] sm:$0xff]  ;;  %s243_s11 = scalar_lea.vmem %s1074_s2, %s242_s22  ;;  %s366_s15 = scalar_lea.sflag [#allocation4], %s969_s30 }
  0x60   : > { %512 = vmatprep.subr.bf16.mxu0 %v511_v8  ;;  %540 = vmatprep.subr.bf16.mxu1 %v511_v8  ;;  %v262_v19 = vld [vmem:[%s973_s7 + $0x68] sm:$0xff]  ;;  %v264_v20 = vld [vmem:[%s973_s7 + $0x78] sm:$0xff]  ;;  %v517_v21 = vpack.c.bf16 %v259_v18, %v257_v17  ;;  %v261_v23 = vld [vmem:[%s973_s7 + $0x60] sm:$0xff]  ;;  %s691_s4 = scalar_lea.vmem %s1018_s18, 256  ;;  %s783_s6 = smov [#allocation7]  }
  0x61   : > { %352 = vmatprep.mubr.f32.mxu0 %v246_v15  ;;  %357 = vmatprep.mubr.f32.mxu1 %v248_v16  ;;  %v519_v22 = vpack.c.bf16 %v264_v20, %v262_v19  ;;  %v263_v24 = vld [vmem:[%s973_s7 + $0x70] sm:$0xff]  ;;  %v266_v25 = vld [vmem:[%s973_s7 + $0x88] sm:$0xff]  ;;  %v268_v26 = vld [vmem:[%s973_s7 + $0x98] sm:$0xff]  ;;  %p692_p6 = scmp.ne.s32.totalorder %s1018_s18, %s691_s4  ;;  %s695_s19 = sshll.u32 %s783_s6, 4  ;;  %s696_s19 = int_to_ptr.vmem [resolvable:$false] %s695_s19 }
  0x62   : > { %v521_v27 = vpack.c.bf16 %v263_v24, %v261_v23  ;;  %v523_v28 = vpack.c.bf16 %v268_v26, %v266_v25  ;;  %v265_v29 = vld [vmem:[%s973_s7 + $0x80] sm:$0xff]  ;;  %v267_v30 = vld [vmem:[%s973_s7 + $0x90] sm:$0xff]  ;;  %v270_v31 = vld [vmem:[%s973_s7 + $0xa8] sm:$0xff]  ;;  %s697_s29 = scalar_lea.vmem %s696_s19, 512  ;;  %p698_p11 = scmp.lt.s32.totalorder %s1018_s18, %s696_s19 }
  0x63   : > { %v272_v32 = vld [vmem:[%s973_s7 + $0xb8] sm:$0xff]  ;;  %v525_v33 = vpack.c.bf16 %v267_v30, %v265_v29  ;;  %v269_v35 = vld [vmem:[%s973_s7 + $0xa0] sm:$0xff]  ;;  %v271_v36 = vld [vmem:[%s973_s7 + $0xb0] sm:$0xff]  ;;  %p693_p8 = pnand %p692_p6, %p906_p10  ;;  %p699_p0 = scmp.lt.s32.totalorder %s697_s29, %s691_s4 }
  0x64   : > { %v527_v34 = vpack.c.bf16 %v272_v32, %v270_v31  ;;  %v274_v37 = vld [vmem:[%s973_s7 + $0xc8] sm:$0xff]  ;;  %v276_v38 = vld [vmem:[%s973_s7 + $0xd8] sm:$0xff]  ;;  %v529_v39 = vpack.c.bf16 %v271_v36, %v269_v35  ;;  %v273_v41 = vld [vmem:[%s973_s7 + $0xc0] sm:$0xff] }
  0x65   : > { %v531_v40 = vpack.c.bf16 %v276_v38, %v274_v37  ;;  %v275_v42 = vld [vmem:[%s973_s7 + $0xd0] sm:$0xff]  ;;  %v278_v43 = vld [vmem:[%s973_s7 + $0xe8] sm:$0xff]  ;;  %v280_v44 = vld [vmem:[%s973_s7 + $0xf8] sm:$0xff]  ;;  %p694_p12 = pneg %p693_p8  ;;  %p700_p5 = por %p699_p0, %p698_p11 }
  0x66   : > { %v533_v45 = vpack.c.bf16 %v275_v42, %v273_v41  ;;  %v535_v46 = vpack.c.bf16 %v280_v44, %v278_v43  ;;  %v277_v47 = vld [vmem:[%s973_s7 + $0xe0] sm:$0xff]  ;;  %v279_v48 = vld [vmem:[%s973_s7 + $0xf0] sm:$0xff] }
  0x67   : > { %514 = vmatpush1.bf16.xpose.msra.mxu0 %v513_v13  ;;  %548 = vmatpush1.bf16.xpose.msra.mxu1 %v513_v13  ;;  %v537_v49 = vpack.c.bf16 %v279_v48, %v277_v47  ;;  %v245_v50 = vld [vmem:[#allocation2] sm:$0xff]  ;;  %v247_v51 = vld [vmem:[#allocation2 + $0x10] sm:$0xff]  ;;  %p701_p9 = pnand %p700_p5, %p694_p12 }
  0x68   : > { %516 = vmatprep.subr.bf16.mxu0 %v515_v14  ;;  %541 = vmatprep.subr.bf16.mxu1 %v515_v14  ;;  %v500_v52 = vld [vmem:[%s243_s11] ss:$0 sm:$0xff] }
  0x6f   : > { %518 = vmatpush1.bf16.xpose.msra.mxu0 %v517_v21  ;;  %549 = vmatpush1.bf16.xpose.msra.mxu1 %v517_v21 }
  0x70   : > { %520 = vmatprep.subr.bf16.mxu0 %v519_v22  ;;  %542 = vmatprep.subr.bf16.mxu1 %v519_v22 }
  0x77   : > { %522 = vmatpush1.bf16.xpose.msra.mxu0 %v521_v27  ;;  %550 = vmatpush1.bf16.xpose.msra.mxu1 %v521_v27 }
  0x78   : > { %524 = vmatprep.subr.bf16.mxu0 %v523_v28  ;;  %543 = vmatprep.subr.bf16.mxu1 %v523_v28 }
  0x7f   : > { %526 = vmatpush1.bf16.xpose.msra.mxu0 %v525_v33  ;;  %551 = vmatpush1.bf16.xpose.msra.mxu1 %v525_v33 }
  0x80   : > { %528 = vmatprep.subr.bf16.mxu0 %v527_v34  ;;  %544 = vmatprep.subr.bf16.mxu1 %v527_v34 }
  0x87   : > { %530 = vmatpush1.bf16.xpose.msra.mxu0 %v529_v39  ;;  %552 = vmatpush1.bf16.xpose.msra.mxu1 %v529_v39 }
  0x88   : > { %532 = vmatprep.subr.bf16.mxu0 %v531_v40  ;;  %545 = vmatprep.subr.bf16.mxu1 %v531_v40 }
  0x8f   : > { %534 = vmatpush1.bf16.xpose.msra.mxu0 %v533_v45  ;;  %553 = vmatpush1.bf16.xpose.msra.mxu1 %v533_v45 }
  0x90   : > { %536 = vmatprep.subr.bf16.mxu0 %v535_v46  ;;  %546 = vmatprep.subr.bf16.mxu1 %v535_v46 }
  0x97   : > { %538 = vmatpush1.bf16.xpose.msra.mxu0 %v537_v49  ;;  %554 = vmatpush1.bf16.xpose.msra.mxu1 %v537_v49 }
  0x9e   : > { %353 = vmatmul.mubr.f32.vlgmr.msra.gmra.mrb[0].mxu0 %v245_v50  ;;  %358 = vmatmul.mubr.f32.vlgmr.msra.gmra.mrb[0].mxu1 %v247_v51 }
 0x171   : > { %v354_v53 = vpop.f32.mrb[0].mxu0  ;;  %v359_v54 = vpop.f32.mrb[0].mxu1 }
 0x172   : > { %v355_v55 = vadd.f32 %v500_v52, %v354_v53  ;;  %v360_v56 = vadd.f32 %v500_v52, %v359_v54  ;;  %v356_v57 = vpop.f32.mrb[1].mxu0  ;;  %v361_v58 = vpop.f32.mrb[1].mxu1 }
 0x174   : > { %363 = vst [vmem:[%s238_s9] sm:$0xff] %v355_v55  ;;  %364 = vst [vmem:[%s238_s9 + $0x8] sm:$0xff] %v360_v56 }
 0x175   : > { %704 = shalt.err (!%p701_p9)
}
 0x176   : > { %s705_s7 = scalar_lea.hbm %s1023_s21, 256  ;;  %s709_s24 = scalar_lea.hbm %s1075_s3, 512 }
 0x177   : > { %p706_p1 = scmp.ne.s32.totalorder %s1023_s21, %s705_s7  ;;  %p710_p7 = scmp.lt.u32.totalorder %s1023_s21, %s1075_s3 }
 0x178   : > { %p711_p13 = scmp.lt.u32.totalorder %s709_s24, %s705_s7  ;;  %p713_p6 = scmp.lt.u32.totalorder %s705_s7, %s1023_s21 }
 0x179   : > { %p707_p2 = pnand %p706_p1, %p906_p10 }
 0x17a   : > { %p712_p4 = por %p711_p13, %p710_p7 }
 0x17b   : > { %p708_p3 = pneg %p707_p2 }
 0x17c   : > { %p714_p8 = por %p713_p6, %p712_p4 }
 0x17e   : > { %p715_p12 = pnand %p714_p8, %p708_p3 }
 0x180   : > { %718 = shalt.err (!%p715_p12)
}
 0x181   : > { %s784_s9 = smov 128   ;;  %s785_s25 = smov 256  }
 0x182   : > { %s786_s8 = smov 8  }
 0x183   : > { %561 = dma.vmem_to_hbm [thread:$0]  (%p906_p10), %s1018_s18, 256, %s1023_s21, %s366_s15, %s784_s9, %s785_s25, %s786_s8  }
 0x184 PF: > { %s396_s26 = sand.u32 1, %s757_s12   ;;  %p1093_p11 = scmp.ne.s32.totalorder %s1083_s23, 0 }
 0x185   : > { %p1094_p0 = scmp.ge.s32.totalorder %s777_s17, 2  ;;  %s397_s4 = scalar_lea.sflag [#allocation4], %s396_s26 }
 0x187   : > { %p572_p5 = pnand %p1094_p0, %p1093_p11 }
 0x189   : > { %752 = dma.done.wait (!%p572_p5), %s397_s4, 256  }
 0x18a   : > { %754 = vsyncadd (!%p572_p5), %s397_s4, 4294967040  ;;  %s20_s17 = sadd.s32 1, %s777_s17   ;;  %s1095_s12 = smov %s761_s13 }
 0x18b   : > { %p17_p9 = scmp.ge.s32.totalorder %s20_s17, 4   ;;  %s1096_s13 = smov %s765_s14 }
 0x18c   : > { %s1097_s14 = smov %s915_s5  ;;  %s1098_s15 = smov %s773_s16 }
 0x18d   : > { %s1099_s16 = smov %s1101_s28  ;;  %19 = sbr.rel (!%p17_p9) target bundleno = 7 (0x7), region = 86 }
 0x194   :  { %402 = vsyncpa [#allocation3], 1 }
 0x195   :  { %404 = vsyncpa [#allocation3 + $0x1], 1 }
 0x196   :  { %405 = vsyncpa [#allocation6], 1 }
 0x197   :  { %407 = vsyncpa [#allocation6 + $0x1], 1 }
 0x198   :  { %408 = vsyncpa [#allocation4], 1 }
 0x199   :  { %410 = vsyncpa [#allocation4 + $0x1], 1 }

</bundles_post_ra>
